<compile_context>
chip_gen: v7x
topology: tpu7x:2x2x1
jax: 0.10.0
libtpu: 0.0.40
codegen_flags: <defaults>
</compile_context>

<pallas_src>
import jax
import jax.numpy as jnp
from jax.experimental import pallas as pl
from jax.experimental.pallas import tpu as pltpu


def _unit2mel_cond_kernel(units_ref, side_ref, const_ref, wu_ref, ws_ref, o_ref):
    # Main MXU matmul: (tile_t, C) @ (C, H) with f32 accumulation.
    x = jnp.dot(units_ref[0], wu_ref[...], preferred_element_type=jnp.float32)
    # Side features [log1p(f0/700), volume, 0...] @ stacked [wf; wv; 0...].
    x = x + jnp.dot(side_ref[0], ws_ref[...], preferred_element_type=jnp.float32)
    # Per-batch constant: spk_embed + (aug/5)*wa + (bu + bf + bv).
    x = x + const_ref[0]
    o_ref[0] = x.astype(o_ref.dtype)


def unit2mel_condition(units, f0, volume, spk_id, aug_shift, params, *,
                       tile_t=512, matmul_dtype=jnp.float32):
    """Pallas implementation of the Unit2Mel embedding/conditioning stage."""
    B, T, C = units.shape
    H = params["unit_w"].shape[1]

    # ---- Lane-dense output: pad hidden axis to a multiple of 128. ----
    H_pad = ((H + 127) // 128) * 128

    def pad_h(a):
        if H_pad == H:
            return a
        pad_width = [(0, 0)] * (a.ndim - 1) + [(0, H_pad - H)]
        return jnp.pad(a, pad_width)

    # ---- Frame tiling: big tiles, multiple of 8 sublanes, batches separate. ----
    tile_t = min(tile_t, T)
    if tile_t < T:
        tile_t = max(8, (tile_t // 8) * 8)
    T_pad = pl.cdiv(T, tile_t) * tile_t

    def pad_t(a):
        if T_pad == T:
            return a
        return jnp.pad(a, ((0, 0), (0, T_pad - T), (0, 0)))

    # Main matmul operands (optionally bf16 for halved HBM read on v6e/v7x).
    units_k = units if units.dtype == matmul_dtype else units.astype(matmul_dtype)
    units_k = pad_t(units_k)
    wu = pad_h(params["unit_w"].astype(matmul_dtype))                  # (C, H_pad)

    # Side features: [log1p(f0/700), volume] padded to 8 columns (f32).
    f0_feat = jnp.log1p(f0.astype(jnp.float32) / 700.0)                # (B, T, 1)
    vol_feat = volume.astype(jnp.float32)                              # (B, T, 1)
    zeros = jnp.zeros_like(f0_feat)
    side = jnp.concatenate([f0_feat, vol_feat] + [zeros] * 6, axis=-1)  # (B, T, 8)
    side = pad_t(side)

    ws = jnp.zeros((8, H_pad), jnp.float32)
    ws = ws.at[0, :H].set(params["f0_w"]).at[1, :H].set(params["vol_w"])

    # Per-batch constant: nn.Embedding lookup + pitch-aug term + all biases.
    bias = (params["unit_b"] + params["f0_b"] + params["vol_b"]).reshape(1, H)
    spk_vec = params["spk_table"][spk_id[:, 0] - 1]                    # (B, H)
    aug = aug_shift.reshape(B, 1).astype(jnp.float32) * 0.2            # aug / 5
    const = spk_vec + aug * params["aug_w"].reshape(1, H) + bias       # (B, H)
    const = pad_h(const).reshape(B, 1, H_pad)

    grid = (B, T_pad // tile_t)

    out = pl.pallas_call(
        _unit2mel_cond_kernel,
        out_shape=jax.ShapeDtypeStruct((B, T_pad, H_pad), jnp.float32),
        grid_spec=pltpu.PrefetchScalarGridSpec(
            num_scalar_prefetch=0,
            grid=grid,
            in_specs=[
                pl.BlockSpec((1, tile_t, C), lambda b, t: (b, t, 0)),      # units
                pl.BlockSpec((1, tile_t, 8), lambda b, t: (b, t, 0)),      # side feats
                pl.BlockSpec((1, 1, H_pad), lambda b, t: (b, 0, 0)),       # batch const
                pl.BlockSpec((C, H_pad), lambda b, t: (0, 0)),             # Wu
                pl.BlockSpec((8, H_pad), lambda b, t: (0, 0)),             # [wf; wv]
            ],
            out_specs=pl.BlockSpec((1, tile_t, H_pad), lambda b, t: (b, t, 0)),
        ),
        compiler_params=pltpu.CompilerParams(
            dimension_semantics=("parallel", "parallel"),
            vmem_limit_bytes=32 * 1024 * 1024,
        ),
    )(units_k, side, const, wu, ws)

    return out[:, :T, :H]


def _reference(units, f0, volume, spk_id, aug_shift, params):
    H = params["unit_w"].shape[1]
    x = units @ params["unit_w"] + params["unit_b"]
    x = x + jnp.log(1.0 + f0 / 700.0) * params["f0_w"].reshape(1, 1, H) + params["f0_b"]
    x = x + volume * params["vol_w"].reshape(1, 1, H) + params["vol_b"]
    x = x + params["spk_table"][spk_id[:, 0] - 1][:, None, :]
    x = x + (aug_shift / 5.0) * params["aug_w"].reshape(1, 1, H)
    return x


def init_params(key, input_channel, n_hidden, n_spk):
    ks = jax.random.split(key, 9)
    s_u = 1.0 / jnp.sqrt(input_channel)
    s_1 = 1.0
    return {
        "unit_w": jax.random.uniform(ks[0], (input_channel, n_hidden), jnp.float32, -s_u, s_u),
        "unit_b": jax.random.uniform(ks[1], (n_hidden,), jnp.float32, -s_u, s_u),
        "f0_w": jax.random.uniform(ks[2], (n_hidden,), jnp.float32, -s_1, s_1),
        "f0_b": jax.random.uniform(ks[3], (n_hidden,), jnp.float32, -s_1, s_1),
        "vol_w": jax.random.uniform(ks[4], (n_hidden,), jnp.float32, -s_1, s_1),
        "vol_b": jax.random.uniform(ks[5], (n_hidden,), jnp.float32, -s_1, s_1),
        "aug_w": jax.random.uniform(ks[6], (n_hidden,), jnp.float32, -s_1, s_1),
        "spk_table": jax.random.normal(ks[7], (n_spk, n_hidden), jnp.float32),
    }


if __name__ == "__main__":
    B, T = 2, 16
    input_channel, n_hidden, n_spk = 32, 32, 4

    key = jax.random.PRNGKey(0)
    k_p, k_u, k_f, k_v, k_s, k_a = jax.random.split(key, 6)

    params = init_params(k_p, input_channel, n_hidden, n_spk)

    units = jax.random.normal(k_u, (B, T, input_channel), jnp.float32)
    f0 = jax.random.uniform(k_f, (B, T, 1), jnp.float32, 100.0, 400.0)
    volume = jax.random.uniform(k_v, (B, T, 1), jnp.float32, 0.0, 1.0)
    spk_id = jax.random.randint(k_s, (B, 1), 1, n_spk + 1)          # 1-based ids
    aug_shift = jax.random.uniform(k_a, (B, 1, 1), jnp.float32, -5.0, 5.0)

    ref = _reference(units, f0, volume, spk_id, aug_shift, params)

    # f32 path (exact).
    out = unit2mel_condition(units, f0, volume, spk_id, aug_shift, params)
    out = jax.block_until_ready(out)
    assert out.shape == (B, T, n_hidden)
    assert jnp.allclose(out, ref, atol=1e-4, rtol=1e-4)

    # bf16 main-matmul path (looser tolerance, for v6e/v7x bandwidth savings).
    out_bf16 = unit2mel_condition(units, f0, volume, spk_id, aug_shift, params,
                                  matmul_dtype=jnp.bfloat16)
    out_bf16 = jax.block_until_ready(out_bf16)
    assert out_bf16.shape == (B, T, n_hidden)
    assert jnp.allclose(out_bf16, ref, atol=1e-1, rtol=1e-1)

    print("KERNEL_OK")
</pallas_src>

<mosaic_0001>
module attributes {stable_mosaic.version = 11 : i64} {
  func.func @_unit2mel_cond_kernel(%arg0: i32, %arg1: i32, %arg2: memref<1x16x32xf32, #tpu.memory_space<vmem>>, %arg3: memref<1x16x8xf32, #tpu.memory_space<vmem>>, %arg4: memref<1x1x128xf32, #tpu.memory_space<vmem>>, %arg5: memref<32x128xf32, #tpu.memory_space<vmem>>, %arg6: memref<8x128xf32, #tpu.memory_space<vmem>>, %arg7: memref<1x16x128xf32, #tpu.memory_space<vmem>>) attributes {dimension_semantics = [#tpu.dimension_semantics<parallel>, #tpu.dimension_semantics<parallel>], iteration_bounds = array<i64: 2, 1>, scalar_prefetch = 0 : i64, scratch_operands = 0 : i64, tpu.core_type = #tpu.core_type<tc>, window_params = [{transform_indices = @transform_0, window_bounds = array<i64: 1, 16, 32>}, {transform_indices = @transform_1, window_bounds = array<i64: 1, 16, 8>}, {transform_indices = @transform_2, window_bounds = array<i64: 1, 1, 128>}, {pipeline_mode = #tpu.pipeline_mode<synchronous>, transform_indices = @transform_3, window_bounds = array<i64: 32, 128>}, {pipeline_mode = #tpu.pipeline_mode<synchronous>, transform_indices = @transform_4, window_bounds = array<i64: 8, 128>}, {transform_indices = @transform_5, window_bounds = array<i64: 1, 16, 128>}]} {
    %c0 = arith.constant 0 : index
    %c0_0 = arith.constant 0 : index
    %c0_1 = arith.constant 0 : index
    %0 = vector.load %arg2[%c0, %c0_0, %c0_1] : memref<1x16x32xf32, #tpu.memory_space<vmem>>, vector<1x16x32xf32>
    %1 = vector.shape_cast %0 : vector<1x16x32xf32> to vector<16x32xf32>
    %c0_2 = arith.constant 0 : index
    %c0_3 = arith.constant 0 : index
    %2 = vector.load %arg5[%c0_2, %c0_3] : memref<32x128xf32, #tpu.memory_space<vmem>>, vector<32x128xf32>
    %cst = arith.constant dense<0.000000e+00> : vector<16x128xf32>
    %3 = tpu.matmul %1, %2, %cst {dimension_numbers = #tpu.dot_dimension_numbers<[1], [0], [0], [1], [0, 0, 1, 1], [], []>} : vector<16x32xf32>, vector<32x128xf32>, vector<16x128xf32> -> vector<16x128xf32>
    %c0_4 = arith.constant 0 : index
    %c0_5 = arith.constant 0 : index
    %c0_6 = arith.constant 0 : index
    %4 = vector.load %arg3[%c0_4, %c0_5, %c0_6] : memref<1x16x8xf32, #tpu.memory_space<vmem>>, vector<1x16x8xf32>
    %5 = vector.shape_cast %4 : vector<1x16x8xf32> to vector<16x8xf32>
    %c0_7 = arith.constant 0 : index
    %c0_8 = arith.constant 0 : index
    %6 = vector.load %arg6[%c0_7, %c0_8] : memref<8x128xf32, #tpu.memory_space<vmem>>, vector<8x128xf32>
    %cst_9 = arith.constant dense<0.000000e+00> : vector<16x128xf32>
    %7 = tpu.matmul %5, %6, %cst_9 {dimension_numbers = #tpu.dot_dimension_numbers<[1], [0], [0], [1], [0, 0, 1, 1], [], []>} : vector<16x8xf32>, vector<8x128xf32>, vector<16x128xf32> -> vector<16x128xf32>
    %8 = arith.addf %3, %7 : vector<16x128xf32>
    %c0_10 = arith.constant 0 : index
    %c0_11 = arith.constant 0 : index
    %c0_12 = arith.constant 0 : index
    %9 = vector.load %arg4[%c0_10, %c0_11, %c0_12] : memref<1x1x128xf32, #tpu.memory_space<vmem>>, vector<1x1x128xf32>
    %10 = vector.shape_cast %9 : vector<1x1x128xf32> to vector<1x128xf32>
    %11 = vector.broadcast %10 : vector<1x128xf32> to vector<16x128xf32>
    %12 = arith.addf %8, %11 : vector<16x128xf32>
    %c0_13 = arith.constant 0 : index
    %c0_14 = arith.constant 0 : index
    %c0_15 = arith.constant 0 : index
    %13 = vector.load %arg7[%c0_13, %c0_14, %c0_15] : memref<1x16x128xf32, #tpu.memory_space<vmem>>, vector<1x16x128xf32>
    %14 = vector.shape_cast %13 : vector<1x16x128xf32> to vector<16x128xf32>
    %15 = vector.shape_cast %12 : vector<16x128xf32> to vector<1x16x128xf32>
    tpu.vector_store %arg7[%c0_13, %c0_14, %c0_15], %15 {strides = array<i32>} : memref<1x16x128xf32, #tpu.memory_space<vmem>>, vector<1x16x128xf32>,
    return
  }
  func.func @transform_0(%arg0: i32, %arg1: i32) -> (i32, i32, i32) {
    %c0_i32 = arith.constant 0 : i32
    %c0_i32_0 = arith.constant 0 : i32
    return %arg0, %arg1, %c0_i32 : i32, i32, i32
  }
  func.func @transform_1(%arg0: i32, %arg1: i32) -> (i32, i32, i32) {
    %c0_i32 = arith.constant 0 : i32
    %c0_i32_0 = arith.constant 0 : i32
    return %arg0, %arg1, %c0_i32 : i32, i32, i32
  }
  func.func @transform_2(%arg0: i32, %arg1: i32) -> (i32, i32, i32) {
    %c0_i32 = arith.constant 0 : i32
    %c0_i32_0 = arith.constant 0 : i32
    %c0_i32_1 = arith.constant 0 : i32
    return %arg0, %c0_i32, %c0_i32_0 : i32, i32, i32
  }
  func.func @transform_3(%arg0: i32, %arg1: i32) -> (i32, i32) {
    %c0_i32 = arith.constant 0 : i32
    %c0_i32_0 = arith.constant 0 : i32
    %c0_i32_1 = arith.constant 0 : i32
    return %c0_i32, %c0_i32_0 : i32, i32
  }
  func.func @transform_4(%arg0: i32, %arg1: i32) -> (i32, i32) {
    %c0_i32 = arith.constant 0 : i32
    %c0_i32_0 = arith.constant 0 : i32
    %c0_i32_1 = arith.constant 0 : i32
    return %c0_i32, %c0_i32_0 : i32, i32
  }
  func.func @transform_5(%arg0: i32, %arg1: i32) -> (i32, i32, i32) {
    %c0_i32 = arith.constant 0 : i32
    %c0_i32_0 = arith.constant 0 : i32
    return %arg0, %arg1, %c0_i32 : i32, i32, i32
  }
}

</mosaic_0001>

<bundles_post_ra>
// kernel: tpu_custom_call.1
= control target key start
LH: loop header
LB: loop body
LE: loop exit
PB: predicated region body
PF: predicated region fallthrough
CT: control target
= control target key end

     0   :  { %10 = vsyncpa [#allocation3], 0  ;;  %s1083_s0 = inlined_call_operand.vmem [shape: f32[2,16,32], index: 0, kind: input, shape index: {}]   ;;  %s1084_s1 = inlined_call_operand.vmem [shape: f32[2,16,8], index: 1, kind: input, shape index: {}]   ;;  %s1085_s2 = inlined_call_operand.vmem [shape: f32[2,1,128], index: 2, kind: input, shape index: {}]   ;;  %s1086_s3 = inlined_call_operand.hbm [shape: f32[32,128], index: 3, kind: input, shape index: {}]   ;;  %s1087_s4 = inlined_call_operand.vmem [shape: f32[8,128], index: 4, kind: input, shape index: {}]   ;;  %s1088_s5 = inlined_call_operand.hbm [shape: f32[2,16,128], index: 5, kind: output, shape index: {}]  }
   0x1   :  { %11 = vsyncpa [#allocation4], 0 }
   0x2   :  { %13 = vsyncpa [#allocation4 + $0x1], 0  ;;  %s915_s18 = smov 0   ;;  %s917_s19 = smov 0  }
   0x3   :  { %s919_s20 = smov 0   ;;  %s921_s21 = smov 0  }
   0x4   :  { %s923_s22 = smov 0   ;;  %s925_s23 = smov 0  }
   0x5 LB: > { %s637_s24 = sadd.s32 4294967295, %s877_s23   ;;  %s638_s25 = sadd.s32 4294967294, %s877_s23   ;;  %s877_s23 = sphi %s925_s23, %s19_s23   ;;  %s873_s22 = sphi %s923_s22, %s1106_s22   ;;  %s869_s21 = sphi %s921_s21, %s1105_s21   ;;  %s865_s20 = sphi %s919_s20, %s1104_s20   ;;  %s861_s19 = sphi %s917_s19, %s1103_s19   ;;  %s857_s18 = sphi %s915_s18, %s1102_s18  }
   0x6   : > { %s31_s26 = sadd.s32 1, %s873_s22  ;;  %s164_s27 = sadd.s32 1, %s865_s20 }
   0x7   : > { %p33_p0 = scmp.ge.s32.totalorder %s31_s26, 2  ;;  %p174_p1 = scmp.ne.s32.totalorder %s865_s20, %s861_s19 }
   0x8   : > { %p175_p2 = scmp.eq.s32.totalorder %s637_s24, 1  ;;  %p180_p3 = scmp.ne.s32.totalorder %s861_s19, %s857_s18 }
   0x9   : > { %s1108_s26 = smov (%p33_p0, %s31_s26), 0  ;;  %p181_p5 = scmp.eq.s32.totalorder %s638_s25, 1 }
   0xa   : > { %p955_p4 = por %p175_p2, %p174_p1  ;;  %s159_s29 = ssub.s32 %s873_s22, %s1108_s26 }
   0xb   : > { %p639_p6 = scmp.ge.s32.totalorder %s877_s23, 1  ;;  %p162_p7 = scmp.eq.s32.totalorder %s159_s29, 0 }
   0xc   : > { %s1093_s28 = scalar_select %p955_p4, 1, 0 }
   0xd   : > { %p962_p8 = por %p181_p5, %p180_p3  ;;  %p188_p9 = scmp.lt.s32.totalorder %s877_s23, 3 }
   0xe   : > { %s968_s6 = scalar_select %p162_p7, %s865_s20, %s164_s27  }
   0xf   : > { %s1094_s30 = scalar_select %p962_p8, 1, 0 }
  0x10   : > { %p970_p10 = pnand %p639_p6, %p188_p9  ;;  %p974_p11 = scmp.eq.s32.totalorder %s637_s24, 0 }
  0x11   : > { %s879_s9 = smov [#allocation2]   ;;  %s767_s14 = scalar_lea.hbm %s1086_s3, 512 }
  0x12   : > { %s1095_s7 = scalar_select %p970_p10, 1, 0 }
  0x13   : > { %s1096_s8 = scalar_select %p974_p11, 1, 0 }
  0x14   : > { %p703_p12 = pneg %p970_p10  ;;  %s200_s10 = sshll.u32 %s879_s9, 4  ;;  %s201_s10 = int_to_ptr.vmem [resolvable:$true] %s200_s10 }
  0x15   : > { %p768_p0 = scmp.ne.s32.totalorder %s1086_s3, %s767_s14  ;;  %p774_p5 = scmp.lt.u32.totalorder %s767_s14, %s1086_s3 }
  0x16   : > { %p982_p13 = pnand %p974_p11, %p703_p12 }
  0x18   : > { %p769_p1 = pneg %p982_p13 }
  0x1a   : > { %p770_p2 = pnand %p769_p1, %p768_p0 }
  0x1c   : > { %p771_p3 = pneg %p770_p2 }
  0x1e   : > { %p776_p6 = pnand %p774_p5, %p771_p3 }
  0x20   : > { %779 = shalt.err (!%p776_p6)
}
  0x21   : > { %s780_s25 = scalar_lea.vmem %s201_s10, 512  ;;  %p788_p8 = scmp.lt.s32.totalorder %s201_s10, %s201_s10 }
  0x22   : > { %p781_p7 = scmp.ne.s32.totalorder %s201_s10, %s780_s25  ;;  %p789_p4 = scmp.lt.s32.totalorder %s780_s25, %s780_s25 }
  0x24   : > { %p783_p9 = pnand %p781_p7, %p769_p1  ;;  %p790_p11 = por %p789_p4, %p788_p8 }
  0x26   : > { %p784_p12 = pneg %p783_p9 }
  0x28   : > { %p791_p10 = pnand %p790_p11, %p784_p12 }
  0x2a   : > { %794 = shalt.err (!%p791_p10)
}
  0x2b   : > { %s880_s27 = smov 128   ;;  %s881_s29 = smov 8  }
  0x2c   : > { %706 = dma.hbm_to_vmem [thread:$0]  (!%p982_p13), %s1086_s3, 512, %s201_s10, [#allocation3], %s880_s27, %s880_s27, %s881_s29  }
  0x2d   : > { %p1098_p0 = scmp.ne.s32.totalorder %s1095_s7, 0 }
  0x2e   : > { %p1099_p2 = scmp.ne.s32.totalorder (!%p1098_p0), %s1096_s8, 0 }
  0x2f   : > { %251 = sbr.rel (%p1098_p0) target bundleno = 299 (0x12b), region = 40 }
  0x36   : > { %848 = dma.done.wait (%p1099_p2), [#allocation3], 512  }
  0x37   : > { %850 = vsyncadd (%p1099_p2), [#allocation3], 4294966784  ;;  %p296_p4 = scmp.lt.s32.totalorder %s869_s21, 1  ;;  %vm328_vm0 = vcmask 64512   ;;  %v321_v0 = vld [vmem:[#allocation2] sm:$0xff]  ;;  %v322_v1 = vld [vmem:[#allocation2 + $0x8] sm:$0xff] }
  0x38   : > { %v323_v2 = vld [vmem:[#allocation2 + $0x10] sm:$0xff]  ;;  %v687_v3 = vpack.c.bf16 %v322_v1, %v321_v0  ;;  %v324_v4 = vld [vmem:[#allocation2 + $0x18] sm:$0xff]  ;;  %v327_v5 = vld [vmem:[%s1087_s4] sm:$0xff]  ;;  %vm410_vm1 = vcmask 261120   ;;  %s292_s25 = sand.u32 1, %s861_s19   ;;  %s661_s15 = sshll.u32 %s869_s21, 8 }
  0x39   : > { %s1010_s13 = scalar_select %p296_p4, %s869_s21, 1  ;;  %v691_v7 = vpack.c.bf16 %v324_v4, %v323_v2  ;;  %671 = vmatprep.subr.mxu1 %v327_v5 }
  0x3a   : > { %688 = vmatprep.subr.bf16.mxu0 %v687_v3  ;;  %672 = vmatpush3.msra.mxu1 %v327_v5  ;;  %s644_s27 = sshll.u32 %s292_s25, 4  ;;  %s1035_s16 = scalar_lea.hbm %s1088_s5, %s661_s15 }
  0x3b   : > { %s659_s11 = sshll.u32 %s1010_s13, 4  ;;  %690 = vmatpush3.bf16.msra.mxu0 %v687_v3  ;;  %s317_s12 = scalar_lea.vmem %s1085_s2, %s1010_s13 }
  0x3c   : > { %s313_s10 = scalar_lea.vmem %s1084_s1, %s659_s11  ;;  %s303_s17 = scalar_lea.vmem %s1083_s0, %s659_s11  ;;  %692 = vmatprep.subr.bf16.mxu0 %v691_v7  ;;  %v653_v14 = vld [vmem:[%s317_s12] ss:$0 sm:$0xff] }
  0x3d   : > { %v325_v6 = vld [vmem:[%s313_s10] sm:$0xff]  ;;  %v326_v8 = vld [vmem:[%s313_s10 + $0x8] sm:$0xff]  ;;  %s294_s11 = scalar_lea.vmem [#allocation5], %s644_s27  ;;  %s1037_s13 = scalar_lea.sflag [#allocation4], %s292_s25 }
  0x3e   : > { %673 = vmatprep.mubr.msk.f32.mxu1 %vm328_vm0, %v325_v6  ;;  %v319_v9 = vld [vmem:[%s303_s17] sm:$0xff]  ;;  %v320_v10 = vld [vmem:[%s303_s17 + $0x8] sm:$0xff]  ;;  %s519_s14 = sshll.u32 %s294_s11, 4  ;;  %p1100_p10 = scmp.ne.s32.totalorder %s1093_s28, 0  ;;  %s1030_s14 = int_to_ptr.vmem [resolvable:$true] %s519_s14 }
  0x3f   : > { %674 = vmatmul.mubr.msk.f32.vlgmr.msra.gmra.mrb[0].mxu1 %vm328_vm0, %v326_v8  ;;  %684 = vmatprep.mubr.msk.f32.mxu0 %vm410_vm1, %v319_v9  ;;  %s795_s21 = scalar_lea.vmem %s1030_s14, 256  ;;  %s882_s17 = smov [#allocation5]  }
  0x40   : > { %694 = vmatpush3.bf16.msra.mxu0 %v691_v7  ;;  %p796_p8 = scmp.ne.s32.totalorder %s1030_s14, %s795_s21  ;;  %s799_s8 = sshll.u32 %s882_s17, 4  ;;  %s800_s8 = int_to_ptr.vmem [resolvable:$false] %s799_s8 }
  0x41   : > { %s801_s24 = scalar_lea.vmem %s800_s8, 512  ;;  %p802_p1 = scmp.lt.s32.totalorder %s1030_s14, %s800_s8 }
  0x42   : > { %p797_p11 = pnand %p796_p8, %p1100_p10  ;;  %p803_p3 = scmp.lt.s32.totalorder %s801_s24, %s795_s21 }
  0x43   : > { %685 = vmatmul.mubr.msk.f32.vlgmr.msra.gmra.mrb[0].mxu0 %vm410_vm1, %v320_v10 }
  0x44   : > { %p798_p13 = pneg %p797_p11  ;;  %p804_p5 = por %p803_p3, %p802_p1 }
  0x46   : > { %p805_p6 = pnand %p804_p5, %p798_p13 }
 0x112   : > { %v675_v11 = vpop.f32.mrb[0].mxu1 }
 0x113   : > { %v401_v12 = vpop.f32.mrb[1].mxu1 }
 0x116   : > { %v686_v13 = vpop.f32.mrb[0].mxu0 }
 0x117   : > { %v489_v15 = vadd.f32 %v686_v13, %v675_v11  ;;  %v483_v16 = vpop.f32.mrb[1].mxu0 }
 0x118   : > { %v484_v17 = vadd.f32 %v483_v16, %v401_v12 }
 0x119   : > { %v500_v18 = vadd.f32 %v653_v14, %v489_v15 }
 0x11a   : > { %v499_v19 = vadd.f32 %v653_v14, %v484_v17 }
 0x11b   : > { %502 = vst [vmem:[%s294_s11 + $0x8] sm:$0xff] %v500_v18 }
 0x11c   : > { %501 = vst [vmem:[%s294_s11] sm:$0xff] %v499_v19 }
 0x11d   : > { %808 = shalt.err (!%p805_p6)
}
 0x11e   : > { %s809_s25 = scalar_lea.hbm %s1035_s16, 256  ;;  %s813_s9 = scalar_lea.hbm %s1088_s5, 512 }
 0x11f   : > { %p810_p7 = scmp.ne.s32.totalorder %s1035_s16, %s809_s25  ;;  %p814_p0 = scmp.lt.u32.totalorder %s1035_s16, %s1088_s5 }
 0x120   : > { %p815_p2 = scmp.lt.u32.totalorder %s813_s9, %s809_s25  ;;  %p817_p8 = scmp.lt.u32.totalorder %s809_s25, %s1035_s16 }
 0x121   : > { %p811_p9 = pnand %p810_p7, %p1100_p10 }
 0x122   : > { %p816_p4 = por %p815_p2, %p814_p0 }
 0x123   : > { %p812_p12 = pneg %p811_p9 }
 0x124   : > { %p818_p11 = por %p817_p8, %p816_p4 }
 0x126   : > { %p819_p13 = pnand %p818_p11, %p812_p12 }
 0x128   : > { %822 = shalt.err (!%p819_p13)
}
 0x129   : > { %s883_s15 = smov 128   ;;  %s884_s10 = smov 8  }
 0x12a   : > { %701 = dma.vmem_to_hbm [thread:$0]  (%p1100_p10), %s1030_s14, 256, %s1035_s16, %s1037_s13, %s883_s15, %s883_s15, %s884_s10  }
 0x12b PF: > { %p713_p1 = scmp.ge.s32.totalorder %s877_s23, 2  ;;  %s534_s7 = sand.u32 1, %s857_s18  }
 0x12c   : > { %p1101_p3 = scmp.ne.s32.totalorder %s1094_s30, 0  ;;  %s535_s21 = scalar_lea.sflag [#allocation4], %s534_s7 }
 0x12e   : > { %p708_p5 = pnand %p713_p1, %p1101_p3 }
 0x130   : > { %852 = dma.done.wait (!%p708_p5), %s535_s21, 256  }
 0x131   : > { %854 = vsyncadd (!%p708_p5), %s535_s21, 4294967040  ;;  %s19_s23 = sadd.s32 1, %s877_s23   ;;  %s1102_s18 = smov %s861_s19 }
 0x132   : > { %p16_p6 = scmp.ge.s32.totalorder %s19_s23, 4   ;;  %s1103_s19 = smov %s865_s20 }
 0x133   : > { %s1104_s20 = smov %s968_s6  ;;  %s1105_s21 = smov %s873_s22 }
 0x134   : > { %s1106_s22 = smov %s1108_s26  ;;  %18 = sbr.rel (!%p16_p6) target bundleno = 5 (0x5), region = 86 }
 0x13b   :  { %540 = vsyncpa [#allocation3], 1 }
 0x13c   :  { %542 = vsyncpa [#allocation3 + $0x1], 1 }
 0x13d   :  { %543 = vsyncpa [#allocation4], 1 }
 0x13e   :  { %545 = vsyncpa [#allocation4 + $0x1], 1 }

</bundles_post_ra>
